<compile_context>
chip_gen: v6e
topology: v6e:2x2x1
jax: 0.10.0
libtpu: 0.0.40
codegen_flags: <defaults>
</compile_context>

<pallas_src>
import jax
import jax.numpy as jnp
from jax import lax
from jax.experimental import pallas as pl
from jax.experimental.pallas import tpu as pltpu


def attention_gate_kernel(g_ref, x_ref, wg_ref, wx_ref, bh_ref,
                          wpsi_ref, bpsi_ref, o_ref):
    """Fused 1x1-conv attention gate on one (image, pixel-tile) block.

    g_ref, x_ref  : (C, TP)  bf16 activations, channel-major, lane-dense pixels
    wg_ref, wx_ref: (Fh, C)  bf16 BN-folded 1x1-conv weights (grid-invariant)
    bh_ref        : (Fh, 1)  f32 fused bias (g-branch + x-branch)
    wpsi_ref      : (Fh, 1)  f32 BN-folded psi weights
    bpsi_ref      : (1, 1)   f32 BN-folded psi bias
    o_ref         : (1, TP)  f32 sigmoid attention map for this pixel tile
    """
    # Both branch 1x1 convs on the MXU: bf16 operands, f32 accumulation.
    h = jnp.dot(wg_ref[...], g_ref[...], preferred_element_type=jnp.float32)
    h = h + jnp.dot(wx_ref[...], x_ref[...], preferred_element_type=jnp.float32)

    # Fused bias + ReLU in f32 on the VPU (TP lanes -> lane-dense).
    h = jnp.maximum(h + bh_ref[...], jnp.float32(0.0))

    # psi projection: M=1 / tiny-K -> VPU weighted sum (skip an MXU f32 pass).
    logit = jnp.sum(wpsi_ref[...] * h, axis=0, keepdims=True) + bpsi_ref[...]
    o_ref[...] = 1.0 / (1.0 + jnp.exp(-logit))                      # (1, TP)


def _round_up(v, m):
    return ((v + m - 1) // m) * m


def attention_block(g, x, p, eps=1e-5):
    """NCHW in / NCHW out Attention_block forward (inference-mode BN)."""
    N, C, H, W = g.shape
    Fh = p["w_g"].shape[0]                        # F_int // 2
    P_img = H * W

    # ---- fold eval-mode BatchNorm into each 1x1 conv (plain-JAX glue) ------
    def fold(w_oihw, b, gamma, beta, mean, var):
        s = gamma / jnp.sqrt(var + eps)                       # (outC,)
        w2d = w_oihw[:, :, 0, 0] * s[:, None]                 # (outC, inC)
        b1d = s * b + (beta - mean * s)                       # (outC,)
        return w2d, b1d

    wg2, bg2 = fold(p["w_g"], p["b_g"], p["gamma_g"], p["beta_g"],
                    p["mean_g"], p["var_g"])
    wx2, bx2 = fold(p["w_x"], p["b_x"], p["gamma_x"], p["beta_x"],
                    p["mean_x"], p["var_x"])
    wp2, bp2 = fold(p["w_psi"], p["b_psi"], p["gamma_psi"], p["beta_psi"],
                    p["mean_psi"], p["var_psi"])

    wg_bf = wg2.astype(jnp.bfloat16)                          # (Fh, C)
    wx_bf = wx2.astype(jnp.bfloat16)                          # (Fh, C)
    b_h = (bg2 + bx2).reshape(Fh, 1).astype(jnp.float32)      # (Fh, 1)
    w_psi = wp2.reshape(Fh, 1).astype(jnp.float32)            # (Fh, 1)
    b_psi = bp2.reshape(1, 1).astype(jnp.float32)             # (1, 1)

    # ---- activations: free contiguous reshape (no transpose, no concat) ----
    # NCHW is channel-major per image already; ship bf16 to halve HBM reads.
    g3 = g.reshape(N, C, P_img).astype(jnp.bfloat16)          # (N, C, P)
    x3 = x.reshape(N, C, P_img).astype(jnp.bfloat16)          # (N, C, P)

    # ---- pixel-tile size: budget by bytes against the scoped-VMEM limit ----
    try:
        vmem_cap = int(pltpu.get_tpu_info().vmem_capacity_bytes)
    except Exception:                                          # pragma: no cover
        vmem_cap = 64 * 1024 * 1024                            # v7x-safe fallback
    vmem_limit = int(min((vmem_cap * 3) // 4, 96 * 1024 * 1024))
    act_budget = vmem_limit // 2                               # headroom for out/weights
    bytes_per_lane = 2 * 2 * C * 2                             # 2 bufs * (g + x) * bf16
    tp_cap = max(256, ((act_budget // bytes_per_lane) // 128) * 128)
    TP = min(_round_up(P_img, 128), tp_cap)                    # lane tile, %128==0
    # Keep the grid at >= 2 steps so the v7x megacore split has work to share.
    if N == 1 and TP >= P_img and P_img >= 256:
        TP = _round_up(pl.cdiv(P_img, 2), 128)
    grid = (N, pl.cdiv(P_img, TP))

    flops = int(N * P_img * (4 * Fh * C + 3 * Fh + 6))
    transcendentals = int(N * P_img)
    bytes_accessed = int(2 * 2 * C * N * P_img + 4 * N * P_img
                         + 2 * 2 * Fh * C + 4 * (2 * Fh + 1))

    out = pl.pallas_call(
        attention_gate_kernel,
        out_shape=jax.ShapeDtypeStruct((N, 1, P_img), jnp.float32),
        grid_spec=pltpu.PrefetchScalarGridSpec(
            num_scalar_prefetch=0,
            grid=grid,
            in_specs=[
                pl.BlockSpec((None, C, TP), lambda n, i: (n, 0, i)),   # g
                pl.BlockSpec((None, C, TP), lambda n, i: (n, 0, i)),   # x
                pl.BlockSpec((Fh, C), lambda n, i: (0, 0)),            # W_g (bf16)
                pl.BlockSpec((Fh, C), lambda n, i: (0, 0)),            # W_x (bf16)
                pl.BlockSpec((Fh, 1), lambda n, i: (0, 0)),            # fused bias
                pl.BlockSpec((Fh, 1), lambda n, i: (0, 0)),            # w_psi
                pl.BlockSpec((1, 1), lambda n, i: (0, 0)),             # b_psi
            ],
            out_specs=pl.BlockSpec((None, 1, TP), lambda n, i: (n, 0, i)),
        ),
        compiler_params=pltpu.CompilerParams(
            dimension_semantics=("parallel", "parallel"),      # v7x: 2 TCs
            vmem_limit_bytes=vmem_limit,
        ),
        cost_estimate=pl.CostEstimate(
            flops=flops, transcendentals=transcendentals,
            bytes_accessed=bytes_accessed),
    )(g3, x3, wg_bf, wx_bf, b_h, w_psi, b_psi)

    return out.reshape(N, 1, H, W)                             # free reshape


def _reference(g, x, p, eps=1e-5):
    """Pure-JAX reference of the Attention_block forward (eval-mode BN)."""
    def conv1x1(y, w, b):
        out = lax.conv_general_dilated(
            y, w, window_strides=(1, 1), padding="VALID",
            dimension_numbers=("NCHW", "OIHW", "NCHW"))
        return out + b.reshape(1, -1, 1, 1)

    def bn(y, gamma, beta, mean, var):
        s = gamma / jnp.sqrt(var + eps)
        return y * s.reshape(1, -1, 1, 1) + (beta - mean * s).reshape(1, -1, 1, 1)

    g1 = bn(conv1x1(g, p["w_g"], p["b_g"]),
            p["gamma_g"], p["beta_g"], p["mean_g"], p["var_g"])
    x1 = bn(conv1x1(x, p["w_x"], p["b_x"]),
            p["gamma_x"], p["beta_x"], p["mean_x"], p["var_x"])
    h = jnp.maximum(g1 + x1, 0.0)
    logit = bn(conv1x1(h, p["w_psi"], p["b_psi"]),
               p["gamma_psi"], p["beta_psi"], p["mean_psi"], p["var_psi"])
    return jax.nn.sigmoid(logit)


if __name__ == "__main__":
    key = jax.random.PRNGKey(0)
    keys = jax.random.split(key, 20)

    N, F_int, H, W = 2, 4, 16, 16
    Fh = F_int // 2

    g = jax.random.normal(keys[0], (N, F_int, H, W), dtype=jnp.float32)
    x = jax.random.normal(keys[1], (N, F_int, H, W), dtype=jnp.float32)

    def bn_params(kg, kb, km, kv, c):
        gamma = 1.0 + 0.1 * jax.random.normal(kg, (c,), dtype=jnp.float32)
        beta = 0.1 * jax.random.normal(kb, (c,), dtype=jnp.float32)
        mean = 0.1 * jax.random.normal(km, (c,), dtype=jnp.float32)
        var = jnp.abs(1.0 + 0.1 * jax.random.normal(kv, (c,), dtype=jnp.float32))
        return gamma, beta, mean, var

    p = {}
    p["w_g"] = 0.3 * jax.random.normal(keys[2], (Fh, F_int, 1, 1), dtype=jnp.float32)
    p["b_g"] = 0.1 * jax.random.normal(keys[3], (Fh,), dtype=jnp.float32)
    p["gamma_g"], p["beta_g"], p["mean_g"], p["var_g"] = bn_params(
        keys[4], keys[5], keys[6], keys[7], Fh)

    p["w_x"] = 0.3 * jax.random.normal(keys[8], (Fh, F_int, 1, 1), dtype=jnp.float32)
    p["b_x"] = 0.1 * jax.random.normal(keys[9], (Fh,), dtype=jnp.float32)
    p["gamma_x"], p["beta_x"], p["mean_x"], p["var_x"] = bn_params(
        keys[10], keys[11], keys[12], keys[13], Fh)

    p["w_psi"] = 0.3 * jax.random.normal(keys[14], (1, Fh, 1, 1), dtype=jnp.float32)
    p["b_psi"] = 0.1 * jax.random.normal(keys[15], (1,), dtype=jnp.float32)
    p["gamma_psi"], p["beta_psi"], p["mean_psi"], p["var_psi"] = bn_params(
        keys[16], keys[17], keys[18], keys[19], 1)

    # TODO(synk): training-mode BatchNorm (batch statistics + running-stat
    # updates) is not implemented; this is inference-mode (folded) BN.
    out = attention_block(g, x, p)
    out = jax.block_until_ready(out)

    ref = _reference(g, x, p)
    assert out.shape == (N, 1, H, W), out.shape
    max_err = float(jnp.max(jnp.abs(out - ref)))
    # bf16 activations/weights on the MXU vs. the f32 reference -> few-milli
    # absolute tolerance on a sigmoid output in (0, 1).
    assert max_err < 5e-3, max_err

    print("KERNEL_OK")
</pallas_src>

<mosaic_0001>
module attributes {stable_mosaic.version = 11 : i64} {
  func.func @attention_gate_kernel(%arg0: i32, %arg1: i32, %arg2: memref<1x4x256xbf16, #tpu.memory_space<vmem>>, %arg3: memref<1x4x256xbf16, #tpu.memory_space<vmem>>, %arg4: memref<2x4xbf16, #tpu.memory_space<vmem>>, %arg5: memref<2x4xbf16, #tpu.memory_space<vmem>>, %arg6: memref<2x1xf32, #tpu.memory_space<vmem>>, %arg7: memref<2x1xf32, #tpu.memory_space<vmem>>, %arg8: memref<1x1xf32, #tpu.memory_space<vmem>>, %arg9: memref<1x1x256xf32, #tpu.memory_space<vmem>>) attributes {dimension_semantics = [#tpu.dimension_semantics<parallel>, #tpu.dimension_semantics<parallel>], iteration_bounds = array<i64: 2, 1>, scalar_prefetch = 0 : i64, scratch_operands = 0 : i64, tpu.core_type = #tpu.core_type<tc>, window_params = [{transform_indices = @transform_0, window_bounds = array<i64: 1, 4, 256>}, {transform_indices = @transform_1, window_bounds = array<i64: 1, 4, 256>}, {pipeline_mode = #tpu.pipeline_mode<synchronous>, transform_indices = @transform_2, window_bounds = array<i64: 2, 4>}, {pipeline_mode = #tpu.pipeline_mode<synchronous>, transform_indices = @transform_3, window_bounds = array<i64: 2, 4>}, {pipeline_mode = #tpu.pipeline_mode<synchronous>, transform_indices = @transform_4, window_bounds = array<i64: 2, 1>}, {pipeline_mode = #tpu.pipeline_mode<synchronous>, transform_indices = @transform_5, window_bounds = array<i64: 2, 1>}, {pipeline_mode = #tpu.pipeline_mode<synchronous>, transform_indices = @transform_6, window_bounds = array<i64: 1, 1>}, {transform_indices = @transform_7, window_bounds = array<i64: 1, 1, 256>}]} {
    %c0 = arith.constant 0 : index
    %c0_0 = arith.constant 0 : index
    %0 = vector.load %arg4[%c0, %c0_0] : memref<2x4xbf16, #tpu.memory_space<vmem>>, vector<2x4xbf16>
    %c0_1 = arith.constant 0 : index
    %c0_2 = arith.constant 0 : index
    %c0_3 = arith.constant 0 : index
    %1 = vector.load %arg2[%c0_1, %c0_2, %c0_3] : memref<1x4x256xbf16, #tpu.memory_space<vmem>>, vector<1x4x256xbf16>
    %2 = vector.shape_cast %1 : vector<1x4x256xbf16> to vector<4x256xbf16>
    %cst = arith.constant dense<0.000000e+00> : vector<2x256xf32>
    %3 = tpu.matmul %0, %2, %cst {dimension_numbers = #tpu.dot_dimension_numbers<[1], [0], [0], [1], [0, 0, 1, 1], [], []>} : vector<2x4xbf16>, vector<4x256xbf16>, vector<2x256xf32> -> vector<2x256xf32>
    %c0_4 = arith.constant 0 : index
    %c0_5 = arith.constant 0 : index
    %4 = vector.load %arg5[%c0_4, %c0_5] : memref<2x4xbf16, #tpu.memory_space<vmem>>, vector<2x4xbf16>
    %c0_6 = arith.constant 0 : index
    %c0_7 = arith.constant 0 : index
    %c0_8 = arith.constant 0 : index
    %5 = vector.load %arg3[%c0_6, %c0_7, %c0_8] : memref<1x4x256xbf16, #tpu.memory_space<vmem>>, vector<1x4x256xbf16>
    %6 = vector.shape_cast %5 : vector<1x4x256xbf16> to vector<4x256xbf16>
    %cst_9 = arith.constant dense<0.000000e+00> : vector<2x256xf32>
    %7 = tpu.matmul %4, %6, %cst_9 {dimension_numbers = #tpu.dot_dimension_numbers<[1], [0], [0], [1], [0, 0, 1, 1], [], []>} : vector<2x4xbf16>, vector<4x256xbf16>, vector<2x256xf32> -> vector<2x256xf32>
    %8 = arith.addf %3, %7 : vector<2x256xf32>
    %c0_10 = arith.constant 0 : index
    %c0_11 = arith.constant 0 : index
    %9 = vector.load %arg6[%c0_10, %c0_11] : memref<2x1xf32, #tpu.memory_space<vmem>>, vector<2x1xf32>
    %10 = vector.broadcast %9 : vector<2x1xf32> to vector<2x256xf32>
    %11 = arith.addf %8, %10 : vector<2x256xf32>
    %cst_12 = arith.constant 0.000000e+00 : f32
    %12 = vector.broadcast %cst_12 : f32 to vector<2x256xf32>
    %13 = arith.maximumf %11, %12 : vector<2x256xf32>
    %c0_13 = arith.constant 0 : index
    %c0_14 = arith.constant 0 : index
    %14 = vector.load %arg7[%c0_13, %c0_14] : memref<2x1xf32, #tpu.memory_space<vmem>>, vector<2x1xf32>
    %15 = vector.broadcast %14 : vector<2x1xf32> to vector<2x256xf32>
    %16 = arith.mulf %15, %13 : vector<2x256xf32>
    %cst_15 = arith.constant dense<0.000000e+00> : vector<256xf32>
    %17 = vector.multi_reduction <add>, %16, %cst_15 [0] : vector<2x256xf32> to vector<256xf32>
    %18 = vector.shape_cast %17 : vector<256xf32> to vector<1x256xf32>
    %c0_16 = arith.constant 0 : index
    %c0_17 = arith.constant 0 : index
    %19 = vector.load %arg8[%c0_16, %c0_17] : memref<1x1xf32, #tpu.memory_space<vmem>>, vector<1x1xf32>
    %20 = vector.broadcast %19 : vector<1x1xf32> to vector<1x256xf32>
    %21 = arith.addf %18, %20 : vector<1x256xf32>
    %cst_18 = arith.constant 0.000000e+00 : f32
    %22 = vector.broadcast %cst_18 : f32 to vector<1x256xf32>
    %23 = arith.subf %22, %21 : vector<1x256xf32>
    %24 = math.exp %23 : vector<1x256xf32>
    %cst_19 = arith.constant 1.000000e+00 : f32
    %25 = vector.broadcast %cst_19 : f32 to vector<1x256xf32>
    %26 = arith.addf %25, %24 : vector<1x256xf32>
    %cst_20 = arith.constant 1.000000e+00 : f32
    %27 = vector.broadcast %cst_20 : f32 to vector<1x256xf32>
    %28 = arith.divf %27, %26 : vector<1x256xf32>
    %c0_21 = arith.constant 0 : index
    %c0_22 = arith.constant 0 : index
    %c0_23 = arith.constant 0 : index
    %29 = vector.load %arg9[%c0_21, %c0_22, %c0_23] : memref<1x1x256xf32, #tpu.memory_space<vmem>>, vector<1x1x256xf32>
    %30 = vector.shape_cast %29 : vector<1x1x256xf32> to vector<1x256xf32>
    %31 = vector.shape_cast %28 : vector<1x256xf32> to vector<1x1x256xf32>
    tpu.vector_store %arg9[%c0_21, %c0_22, %c0_23], %31 {strides = array<i32>} : memref<1x1x256xf32, #tpu.memory_space<vmem>>, vector<1x1x256xf32>,
    return
  }
  func.func @transform_0(%arg0: i32, %arg1: i32) -> (i32, i32, i32) {
    %c0_i32 = arith.constant 0 : i32
    %c0_i32_0 = arith.constant 0 : i32
    return %arg0, %c0_i32, %arg1 : i32, i32, i32
  }
  func.func @transform_1(%arg0: i32, %arg1: i32) -> (i32, i32, i32) {
    %c0_i32 = arith.constant 0 : i32
    %c0_i32_0 = arith.constant 0 : i32
    return %arg0, %c0_i32, %arg1 : i32, i32, i32
  }
  func.func @transform_2(%arg0: i32, %arg1: i32) -> (i32, i32) {
    %c0_i32 = arith.constant 0 : i32
    %c0_i32_0 = arith.constant 0 : i32
    %c0_i32_1 = arith.constant 0 : i32
    return %c0_i32, %c0_i32_0 : i32, i32
  }
  func.func @transform_3(%arg0: i32, %arg1: i32) -> (i32, i32) {
    %c0_i32 = arith.constant 0 : i32
    %c0_i32_0 = arith.constant 0 : i32
    %c0_i32_1 = arith.constant 0 : i32
    return %c0_i32, %c0_i32_0 : i32, i32
  }
  func.func @transform_4(%arg0: i32, %arg1: i32) -> (i32, i32) {
    %c0_i32 = arith.constant 0 : i32
    %c0_i32_0 = arith.constant 0 : i32
    %c0_i32_1 = arith.constant 0 : i32
    return %c0_i32, %c0_i32_0 : i32, i32
  }
  func.func @transform_5(%arg0: i32, %arg1: i32) -> (i32, i32) {
    %c0_i32 = arith.constant 0 : i32
    %c0_i32_0 = arith.constant 0 : i32
    %c0_i32_1 = arith.constant 0 : i32
    return %c0_i32, %c0_i32_0 : i32, i32
  }
  func.func @transform_6(%arg0: i32, %arg1: i32) -> (i32, i32) {
    %c0_i32 = arith.constant 0 : i32
    %c0_i32_0 = arith.constant 0 : i32
    %c0_i32_1 = arith.constant 0 : i32
    return %c0_i32, %c0_i32_0 : i32, i32
  }
  func.func @transform_7(%arg0: i32, %arg1: i32) -> (i32, i32, i32) {
    %c0_i32 = arith.constant 0 : i32
    %c0_i32_0 = arith.constant 0 : i32
    return %arg0, %c0_i32, %arg1 : i32, i32, i32
  }
}

</mosaic_0001>

<bundles_post_ra>
// kernel: tpu_custom_call.1
= control target key start
LH: loop header
LB: loop body
LE: loop exit
PB: predicated region body
PF: predicated region fallthrough
CT: control target
= control target key end

     0   :  { %s1091_s0 = inlined_call_operand.vmem [shape: bf16[2,4,256], index: 0, kind: input, shape index: {}]   ;;  %s1092_s1 = inlined_call_operand.hbm [shape: bf16[2,4,256], index: 1, kind: input, shape index: {}]   ;;  %s1093_s2 = inlined_call_operand.vmem [shape: bf16[2,4], index: 2, kind: input, shape index: {}]   ;;  %s1094_s3 = inlined_call_operand.vmem [shape: bf16[2,4], index: 3, kind: input, shape index: {}]   ;;  %s1095_s4 = inlined_call_operand.vmem [shape: f32[2,1], index: 4, kind: input, shape index: {}]   ;;  %s1096_s5 = inlined_call_operand.vmem [shape: f32[2,1], index: 5, kind: input, shape index: {}]   ;;  %s1097_s6 = inlined_call_operand.<no memory space> [shape: f32[1,1], index: 6, kind: input, shape index: {}]   ;;  %s1098_s7 = inlined_call_operand.hbm [shape: f32[2,1,256], index: 7, kind: output, shape index: {}]  }
   0x1   :  { %v12_v0 = vstv %s1097_s6 }
   0x2   :  { %13 = vst [vmem:[#allocation2] sm:$0x1] %v12_v0 }
   0x3   :  { %14 = vsyncpa [#allocation4], 0 }
   0x4   :  { %16 = vsyncpa [#allocation4 + $0x1], 0 }
   0x5   :  { %17 = vsyncpa [#allocation5], 0 }
   0x6   :  { %19 = vsyncpa [#allocation5 + $0x1], 0  ;;  %s933_s26 = smov 0   ;;  %s935_s27 = smov 0  }
   0x7   :  { %s937_s28 = smov 0   ;;  %s939_s29 = smov 0  }
   0x8   :  { %s941_s30 = smov 0   ;;  %s943_s8 = smov 0  }
   0x9 LB: > { %s676_s6 = sadd.s32 4294967295, %s884_s8   ;;  %s677_s9 = sadd.s32 4294967294, %s884_s8   ;;  %s884_s8 = sphi %s943_s8, %s25_s8   ;;  %s880_s30 = sphi %s941_s30, %s1110_s30   ;;  %s876_s29 = sphi %s939_s29, %s1109_s29   ;;  %s872_s28 = sphi %s937_s28, %s1108_s28   ;;  %s868_s27 = sphi %s935_s27, %s1107_s27   ;;  %s864_s26 = sphi %s933_s26, %s1106_s26  }
   0xa   : > { %s37_s10 = sadd.s32 1, %s880_s30  ;;  %s74_s11 = sadd.s32 1, %s872_s28 }
   0xb   : > { %p39_p0 = scmp.ge.s32.totalorder %s37_s10, 2  ;;  %p81_p1 = scmp.ne.s32.totalorder %s872_s28, %s868_s27 }
   0xc   : > { %p82_p2 = scmp.eq.s32.totalorder %s884_s8, 0  ;;  %p87_p3 = scmp.ne.s32.totalorder %s868_s27, %s864_s26 }
   0xd   : > { %s1112_s10 = smov (%p39_p0, %s37_s10), 0  ;;  %p88_p5 = scmp.eq.s32.totalorder %s676_s6, 0 }
   0xe   : > { %p974_p4 = por %p82_p2, %p81_p1  ;;  %s69_s13 = ssub.s32 %s880_s30, %s1112_s10 }
   0xf   : > { %p218_p6 = scmp.eq.s32.totalorder %s676_s6, 1  ;;  %p72_p7 = scmp.eq.s32.totalorder %s69_s13, 0 }
  0x10   : > { %p980_p8 = por %p88_p5, %p87_p3  ;;  %p224_p10 = scmp.eq.s32.totalorder %s677_s9, 1 }
  0x11   : > { %p984_p9 = por %p218_p6, %p81_p1  ;;  %p714_p13 = scmp.lt.s32.totalorder %s884_s8, 2 }
  0x12   : > { %s989_s16 = scalar_select %p72_p7, %s872_s28, %s74_s11  }
  0x13   : > { %p991_p11 = por %p224_p10, %p87_p3  ;;  %s272_s18 = sand.u32 1, %s872_s28  }
  0x14   : > { %s680_s19 = sshll.u32 %s272_s18, 2  ;;  %s699_s20 = sshll.u32 %s880_s30, 6 }
  0x15   : > { %s1102_s17 = scalar_select %p991_p11, 1, 0 }
  0x16   : > { %s284_s23 = scalar_lea.hbm %s1092_s1, %s699_s20  ;;  %s276_s24 = scalar_lea.vmem [#allocation3], %s680_s19 }
  0x17   : > { %s286_s25 = sshll.u32 %s276_s24, 4  ;;  %p1004_p0 = pnand %p714_p13, %p974_p4  ;;  %s287_s25 = int_to_ptr.vmem [resolvable:$true] %s286_s25 }
  0x18   : > { %p683_p1 = scmp.ge.s32.totalorder %s884_s8, 1  ;;  %p291_p2 = scmp.lt.s32.totalorder %s884_s8, 3 }
  0x19   : > { %s273_s9 = scalar_lea.sflag [#allocation4], %s272_s18  ;;  %p778_p3 = pneg %p1004_p0 }
  0x1a   : > { %s789_s11 = scalar_lea.vmem %s287_s25, 64  ;;  %s886_s13 = smov [#allocation3]  }
  0x1b   : > { %p790_p5 = scmp.ne.s32.totalorder %s287_s25, %s789_s11  ;;  %s794_s20 = sshll.u32 %s886_s13, 4  ;;  %s795_s20 = int_to_ptr.vmem [resolvable:$false] %s794_s20 }
  0x1c   : > { %s796_s19 = scalar_lea.vmem %s795_s20, 128  ;;  %p797_p10 = scmp.lt.s32.totalorder %s287_s25, %s795_s20 }
  0x1d   : > { %p792_p6 = pnand %p790_p5, %p778_p3  ;;  %p798_p12 = scmp.lt.s32.totalorder %s796_s19, %s789_s11 }
  0x1f   : > { %p793_p7 = pneg %p792_p6  ;;  %p799_p4 = por %p798_p12, %p797_p10 }
  0x21   : > { %p800_p13 = pnand %p799_p4, %p793_p7 }
  0x23   : > { %803 = shalt.err (!%p800_p13)
}
  0x24   : > { %709 = dma.hbm_to_vmem [thread:$0]  (!%p1004_p0), %s284_s23, 64, %s287_s25, %s273_s9  }
  0x25   : > { %p292_p11 = pnand %p683_p1, %p291_p2 }
  0x26   : > { %s1019_s12 = sand.u32 (!%p292_p11), 1, %s868_s27  }
  0x27   : > { %295 = sbr.rel (%p292_p11) target bundleno = 329 (0x149), region = 48  ;;  %s684_s18 = sshll.u32 (!%p292_p11), %s1019_s12, 2 }
  0x28   : > { %s298_s21 = scalar_lea.sflag (!%p292_p11), [#allocation4], %s1019_s12  ;;  %s301_s22 = scalar_lea.vmem (!%p292_p11), [#allocation3], %s684_s18 }
  0x2c   : > { %855 = dma.done.wait (%p980_p8), %s298_s21, 64  }
  0x2d   : > { %857 = vsyncadd (%p980_p8), %s298_s21, 4294967232  ;;  %p342_p12 = scmp.lt.s32.totalorder %s876_s29, 1  ;;  %v887_v1 = vmov 0   ;;  %vm371_vm0 = vcmask 1041408   ;;  %v478_v8 = vld [vmem:[%s1095_s4] sm:$0x3]  ;;  %v516_v28 = vlaneseq }
  0x2e   : > { %410 = vmatprep.mubr.bf16.mxu0 %v887_v1  ;;  %469 = vmatprep.mubr.bf16.mxu1 %v887_v1  ;;  %v688_v2 = vld.sshfl [vmem:[%s301_s22] sm:$0x33 pattern:$0x76325410]  ;;  %v510_v9 = vld [vmem:[#allocation2] sm:$0x1] }
  0x2f   : > { %s343_s23 = scalar_select %p342_p12, %s876_s29, 1  ;;  %766 = vset.pattern.permute.xlu0 %v887_v1  ;;  %767 = vset.pattern.permute.xlu1 %v887_v1  ;;  %v366_v3 = vcombine.high %v688_v2, %v688_v2  ;;  %v373_v5 = vsel %vm371_vm0, %v688_v2, 0  ;;  %v356_v10 = vld [vmem:[%s1094_s3] sm:$0x1]  ;;  %vm367_vm1 = vcmask 31744   ;;  %v517_v34 = vshrl.u32 %v516_v28, 7 }
  0x30   : > { %481 = vperm.xlu0 %766, %v478_v8   ;;  %v488_v11 = vld [vmem:[%s1096_s5] sm:$0x3]  ;;  %513 = vperm.xlu1 %767, %v510_v9   ;;  %v888_v60 = vmov 1966171168   ;;  %vm554_vm2 = vcmp.lt.s32.totalorder %v516_v28, 256  ;;  %s558_s13 = scalar_lea.sflag [#allocation5], %s1019_s12 }
  0x31   : > { %s700_s24 = sshll.u32 %s343_s23, 2  ;;  %689 = vmatprep.subr.msk.bf16.mxu0 %vm371_vm0, %v366_v3  ;;  %v354_v12 = vld [vmem:[%s1093_s2] sm:$0x1]  ;;  %v518_v40 = vsub.s32 0, %v517_v34  ;;  %v538_v61 = vunpack.c.l.s4 %v888_v60  ;;  %s685_s23 = sshll.u32 %s1019_s12, 1 }
  0x32   : > { %s349_s9 = scalar_lea.vmem %s1091_s0, %s700_s24  ;;  %393 = vmatpush1.bf16.msra.mxu0 %v373_v5  ;;  %s701_s24 = sshll.u32 %s876_s29, 5 }
  0x33   : > { %v691_v4 = vld.sshfl [vmem:[%s349_s9] sm:$0x33 pattern:$0x76325410]  ;;  %v539_v62 = vunpack.c.0.s8 %v538_v61  ;;  %s340_s25 = scalar_lea.vmem [#allocation6], %s685_s23  ;;  %s572_s11 = scalar_lea.hbm %s1098_s7, %s701_s24 }
  0x34   : > { %v427_v6 = vcombine.high %v691_v4, %v691_v4  ;;  %v432_v7 = vsel %vm371_vm0, %v691_v4, 0  ;;  %491 = vperm.xlu0 %766, %v488_v11   ;;  %s574_s6 = sshll.u32 %s340_s25, 4  ;;  %s889_s19 = smov [#allocation6]   ;;  %s575_s6 = int_to_ptr.vmem [resolvable:$true] %s574_s6 }
  0x35   : > { %690 = vmatmul.mubr.msk.bf16.vlgmr.msra.gmra.mxu0 %vm367_vm1, %v356_v10  ;;  %v542_v0 = vsub.s32 %v539_v62, %v517_v34  ;;  %s804_s20 = scalar_lea.vmem %s575_s6, 32  ;;  %s808_s18 = sshll.u32 %s889_s19, 4  ;;  %s809_s18 = int_to_ptr.vmem [resolvable:$false] %s808_s18 }
  0x36   : > { %692 = vmatprep.subr.msk.bf16.mxu1 %vm371_vm0, %v427_v6  ;;  %p805_p8 = scmp.ne.s32.totalorder %s575_s6, %s804_s20  ;;  %s810_s29 = scalar_lea.vmem %s809_s18, 64 }
  0x37   : > { %452 = vmatpush1.bf16.msra.mxu1 %v432_v7  ;;  %p811_p1 = scmp.lt.s32.totalorder %s575_s6, %s809_s18  ;;  %p812_p2 = scmp.lt.s32.totalorder %s810_s29, %s804_s20 }
  0x38   : > { %p806_p11 = pnand %p805_p8, %p984_p9 }
  0x39   : > { %p813_p3 = por %p812_p2, %p811_p1 }
  0x3a   : > { %693 = vmatmul.mubr.msk.bf16.vlgmr.msra.gmra.mxu1 %vm367_vm1, %v354_v12  ;;  %p807_p0 = pneg %p806_p11 }
  0x3c   : > { %p814_p5 = pnand %p813_p3, %p807_p0 }
  0xab   : > { %v482_v14 = vpop.permute.xlu0 %481  ;;  %v514_v41 = vpop.permute.xlu1 %513 }
  0xac   : > { %v519_v46 = vrot.slane %v514_v41, %v518_v40 }
  0xaf   : > { %v492_v26 = vpop.permute.xlu0 %491 }
  0xf5   : > { %v412_v13 = vpop.f32.mrf.mxu0 }
  0xf7   : > { %v414_v17 = vpop.f32.mrf.mxu0 }
  0xf9   : > { %v416_v21 = vpop.f32.mrf.mxu0 }
  0xfa   : > { %v471_v15 = vpop.f32.mrf.mxu1 }
  0xfb   : > { %v472_v16 = vadd.f32 %v471_v15, %v412_v13  ;;  %v417_v25 = vpop.f32.mrf.mxu0 }
  0xfc   : > { %v473_v18 = vpop.f32.mrf.mxu1 }
  0xfd   : > { %v484_v19 = vadd.f32 %v482_v14, %v472_v16  ;;  %v474_v20 = vadd.f32 %v473_v18, %v414_v17 }
  0xfe   : > { %v475_v22 = vpop.f32.mrf.mxu1 }
  0xff   : > { %v485_v23 = vadd.f32 %v482_v14, %v474_v20  ;;  %v486_v24 = vmax.f32 %v484_v19, 0.0 }
 0x100   : > { %v476_v27 = vpop.f32.mrf.mxu1 }
 0x101   : > { %v487_v29 = vmax.f32 %v485_v23, 0.0  ;;  %v494_v30 = vmul.f32 %v492_v26, %v486_v24 }
 0x103   : > { %v495_v31 = vmul.f32 %v492_v26, %v487_v29  ;;  %v496_v32 = vsel %vm371_vm0, %v494_v30, 0.0 }
 0x104   : > { %v497_v33 = vrot.slane %v496_v32, 4 }
 0x105   : > { %v503_v35 = vsel %vm371_vm0, %v495_v31, 0.0 }
 0x106   : > { %v498_v36 = vadd.f32 %v497_v33, %v496_v32  ;;  %v504_v37 = vrot.slane %v503_v35, 4 }
 0x108   : > { %v499_v38 = vrot.slane %v498_v36, 2  ;;  %v505_v39 = vadd.f32 %v504_v37, %v503_v35 }
 0x10a   : > { %v500_v42 = vadd.f32 %v499_v38, %v498_v36  ;;  %v506_v43 = vrot.slane %v505_v39, 2 }
 0x10c   : > { %v507_v44 = vadd.f32 %v506_v43, %v505_v39  ;;  %v501_v45 = vrot.slane %v500_v42, 1 }
 0x10e   : > { %v502_v47 = vadd.f32 %v501_v45, %v500_v42  ;;  %v508_v48 = vrot.slane %v507_v44, 1 }
 0x110   : > { %v509_v49 = vadd.f32 %v508_v48, %v507_v44  ;;  %v520_v50 = vadd.f32 %v519_v46, %v502_v47 }
 0x112   : > { %v521_v51 = vadd.f32 %v519_v46, %v509_v49  ;;  %v522_v52 = vsub.f32 0.0, %v520_v50 }
 0x114   : > { %v523_v53 = vsub.f32 0.0, %v521_v51  ;;  %v524_v54 = vmul.f32 1.442695, %v522_v52 }
 0x116   : > { %768 = vpow2.f32 %v524_v54  ;;  %v526_v55 = vmul.f32 1.442695, %v523_v53 }
 0x118   : > { %770 = vpow2.f32 %v526_v55 }
 0x123   : > { %v769_v56 = vpop.eup %768 }
 0x124   : > { %v528_v57 = vadd.f32 1.0, %v769_v56 }
 0x125   : > { %v771_v58 = vpop.eup %770 }
 0x126   : > { %v529_v59 = vadd.f32 1.0, %v771_v58  ;;  %772 = vrcp.f32 %v528_v57 }
 0x128   : > { %774 = vrcp.f32 %v529_v59 }
 0x133   : > { %v773_v63 = vpop.eup %772 }
 0x135   : > { %v775_v1 = vpop.eup %774 }
 0x136   : > { %v536_v2 = vcombine.low %v773_v63, %v775_v1 }
 0x138   : > { %v543_v3 = vrot.slane %v536_v2, %v542_v0 }
 0x13a   : > { %v550_v4 = vrot.slane %v543_v3, %v542_v0 }
 0x13c   : > { %556 = vst.msk [vmem:[%s340_s25] sm:$0x3] %vm554_vm2, %v550_v4 }
 0x13d   : > { %817 = shalt.err (!%p814_p5)
}
 0x13e   : > { %s818_s21 = scalar_lea.hbm %s572_s11, 32  ;;  %s822_s23 = scalar_lea.hbm %s1098_s7, 64 }
 0x13f   : > { %p819_p6 = scmp.ne.s32.totalorder %s572_s11, %s818_s21  ;;  %p823_p4 = scmp.lt.s32.totalorder %s572_s11, %s1098_s7 }
 0x140   : > { %p824_p13 = scmp.lt.s32.totalorder %s822_s23, %s818_s21 }
 0x141   : > { %p820_p7 = pnand %p819_p6, %p984_p9 }
 0x142   : > { %p825_p12 = por %p824_p13, %p823_p4 }
 0x143   : > { %p821_p10 = pneg %p820_p7 }
 0x145   : > { %p826_p8 = pnand %p825_p12, %p821_p10 }
 0x147   : > { %829 = shalt.err (!%p826_p8)
}
 0x148   : > { %704 = dma.vmem_to_hbm [thread:$0]  (%p984_p9), %s575_s6, 32, %s572_s11, %s558_s13  }
 0x149 PF: > { %s586_s9 = sand.u32 1, %s864_s26   ;;  %p1104_p11 = scmp.ne.s32.totalorder %s1102_s17, 0 }
 0x14a   : > { %p1105_p0 = scmp.ge.s32.totalorder %s884_s8, 2  ;;  %s587_s14 = scalar_lea.sflag [#allocation5], %s586_s9 }
 0x14c   : > { %p711_p1 = pnand %p1105_p0, %p1104_p11 }
 0x14e   : > { %p712_p2 = pneg %p711_p1 }
 0x150   : > { %859 = dma.done.wait (%p712_p2), %s587_s14, 32  }
 0x151   : > { %861 = vsyncadd (%p712_p2), %s587_s14, 4294967264  ;;  %s25_s8 = sadd.s32 1, %s884_s8   ;;  %s1106_s26 = smov %s868_s27 }
 0x152   : > { %p22_p3 = scmp.ge.s32.totalorder %s25_s8, 4   ;;  %s1107_s27 = smov %s872_s28 }
 0x153   : > { %s1108_s28 = smov %s989_s16  ;;  %s1109_s29 = smov %s880_s30 }
 0x154   : > { %s1110_s30 = smov %s1112_s10  ;;  %24 = sbr.rel (!%p22_p3) target bundleno = 9 (0x9), region = 96 }
 0x159   :  { %592 = vsyncpa [#allocation4], 1 }
 0x15a   :  { %594 = vsyncpa [#allocation4 + $0x1], 1 }
 0x15b   :  { %595 = vsyncpa [#allocation5], 1 }
 0x15c   :  { %597 = vsyncpa [#allocation5 + $0x1], 1 }

</bundles_post_ra>
